<compile_context>
chip_gen: v6e
topology: v6e:2x2x1
jax: 0.10.0
libtpu: 0.0.40
codegen_flags: <defaults>
</compile_context>

<pallas_src>
import numpy as np
import jax
import jax.numpy as jnp
from jax.experimental import pallas as pl
from jax.experimental.pallas import tpu as pltpu

_LANES = 128             # lane width (last dim of the 2D slab)
_MAX_BLOCK_ROWS = 2048   # 2048 x 128 x 4B = 1 MiB per f32 block


def _round_up(x, m):
    return (x + m - 1) // m * m


def _fused_contrast_kernel(scalars_ref, x_ref, o_ref, acc_ref, off_ref):
    # scalars_ref (SMEM, prefetched): [scale, 1/total_elements]
    # acc_ref: (block_rows, 128) f32 VMEM partial-sum accumulator (VPU adds only)
    # off_ref: (1, 1) f32 VMEM scratch holding offset = mean * (1 - scale)
    p = pl.program_id(0)          # phase: 0 = reduce, 1 = apply
    i = pl.program_id(1)          # row-block
    nblk = pl.num_programs(1)

    @pl.when(p == 0)
    def _phase0():
        @pl.when(i == 0)
        def _():
            acc_ref[...] = jnp.zeros_like(acc_ref)

        # Pure VPU elementwise accumulation; the XLU cross-lane reduce happens
        # exactly once, at the last block of phase 0.
        acc_ref[...] += x_ref[...].astype(jnp.float32)

        @pl.when(i == nblk - 1)
        def _():
            scale = scalars_ref[0]
            inv_total = scalars_ref[1]
            total_sum = jnp.sum(acc_ref[...], keepdims=True)      # (1, 1)
            mean = total_sum * inv_total
            off_ref[...] = mean * (1.0 - scale)

    @pl.when(p == 1)
    def _phase1():
        scale = scalars_ref[0]
        xf = x_ref[...].astype(jnp.float32)
        # (x - mean) * scale + mean  ==  x * scale + mean * (1 - scale)
        o_ref[...] = (xf * scale + off_ref[...]).astype(o_ref.dtype)


def random_contrast(x, contrast_sample):
    """x: any-shape float array (e.g. NCHW). contrast_sample in [-cf, cf]."""
    orig_shape = x.shape
    orig_dtype = x.dtype
    total = int(np.prod(orig_shape))

    # Flatten to a lane-dense (rows, 128) slab; zero-pad rows to a multiple of
    # the row-block size.  Zero padding leaves the sum untouched, the mean
    # divides by the true element count, and padded outputs are sliced off.
    rows = -(-total // _LANES)                                  # cdiv
    block_rows = min(_MAX_BLOCK_ROWS, _round_up(rows, 8))
    rows_padded = _round_up(rows, block_rows)
    padded_total = rows_padded * _LANES

    x_flat = jnp.ravel(x)                                       # original dtype, no f32 copy
    if padded_total != total:
        x_flat = jnp.pad(x_flat, (0, padded_total - total))
    x2d = x_flat.reshape(rows_padded, _LANES)

    scale = jnp.float32(1.0 + contrast_sample)
    inv_total = jnp.float32(1.0 / total)
    scalars = jnp.stack([scale, inv_total]).astype(jnp.float32)

    num_blocks = rows_padded // block_rows

    y2d = pl.pallas_call(
        _fused_contrast_kernel,
        out_shape=jax.ShapeDtypeStruct((rows_padded, _LANES), orig_dtype),
        grid_spec=pltpu.PrefetchScalarGridSpec(
            num_scalar_prefetch=1,
            grid=(2, num_blocks),                               # (phase, row-block)
            in_specs=[pl.BlockSpec((block_rows, _LANES),
                                   lambda p, i, s: (i, 0))],
            # Phase 0 never writes the output; park it on block 0 (i * p == 0
            # when p == 0) so phase 1 owns every block's final writeback.
            out_specs=pl.BlockSpec((block_rows, _LANES),
                                   lambda p, i, s: (i * p, 0)),
            scratch_shapes=[
                pltpu.VMEM((block_rows, _LANES), jnp.float32),  # partial-sum acc
                pltpu.VMEM((1, 1), jnp.float32),                # offset scalar
            ],
        ),
        compiler_params=pltpu.CompilerParams(
            # Both axes carry state (acc across row-blocks, offset across
            # phases) so they must stay sequential.
            # TODO(synk): on v7x (2 TCs) a megacore-parallel partial-sum pass
            # would shard the reduction; this fused form runs on one core.
            dimension_semantics=("arbitrary", "arbitrary"),
        ),
    )(scalars, x2d)

    return y2d.reshape(-1)[:total].reshape(orig_shape)


def _reference(x, contrast_sample):
    mean = jnp.mean(x)
    return (x - mean) * (1.0 + contrast_sample) + mean


if __name__ == "__main__":
    # Deterministic inputs.
    key = jax.random.PRNGKey(0)
    x = jax.random.normal(key, (2, 4, 16, 16), dtype=jnp.float32)  # NCHW

    # Deterministic stand-in for np.random.uniform(-cf, cf) in forward().
    contrast_factor = 0.2
    rng = np.random.default_rng(0)
    contrast_sample = float(rng.uniform(-contrast_factor, contrast_factor))

    y = random_contrast(x, contrast_sample)
    y = jax.block_until_ready(y)
    np.testing.assert_allclose(np.asarray(y),
                               np.asarray(_reference(x, contrast_sample)),
                               rtol=1e-5, atol=1e-5)

    # Non-(8,128)-aligned shape exercises the zero-padding path.
    x_odd = jax.random.normal(jax.random.PRNGKey(1), (2, 3, 15, 17),
                              dtype=jnp.float32)
    y_odd = jax.block_until_ready(random_contrast(x_odd, contrast_sample))
    np.testing.assert_allclose(np.asarray(y_odd),
                               np.asarray(_reference(x_odd, contrast_sample)),
                               rtol=1e-5, atol=1e-5)

    print("KERNEL_OK")
</pallas_src>

<mosaic_0001>
module attributes {stable_mosaic.version = 11 : i64} {
  func.func @_fused_contrast_kernel(%arg0: i32, %arg1: i32, %arg2: memref<2xf32, #tpu.memory_space<smem>>, %arg3: memref<16x128xf32, #tpu.memory_space<vmem>>, %arg4: memref<16x128xf32, #tpu.memory_space<vmem>>, %arg5: memref<16x128xf32, #tpu.memory_space<vmem>>, %arg6: memref<1x1xf32, #tpu.memory_space<vmem>>) attributes {dimension_semantics = [#tpu.dimension_semantics<arbitrary>, #tpu.dimension_semantics<arbitrary>], iteration_bounds = array<i64: 2, 1>, scalar_prefetch = 1 : i64, scratch_operands = 2 : i64, tpu.core_type = #tpu.core_type<tc>, window_params = [{transform_indices = @transform_0, window_bounds = array<i64: 16, 128>}, {transform_indices = @transform_1, window_bounds = array<i64: 16, 128>}]} {
    %c0_i32 = arith.constant 0 : i32
    %0 = arith.cmpi eq, %arg0, %c0_i32 : i32
    %1 = arith.extui %0 : i1 to i32
    %c0_i32_0 = arith.constant 0 : i32
    %2 = arith.cmpi ne, %1, %c0_i32_0 : i32
    scf.if %2 {
      %c0_i32_2 = arith.constant 0 : i32
      %6 = arith.cmpi eq, %arg1, %c0_i32_2 : i32
      %7 = arith.extui %6 : i1 to i32
      %c0_i32_3 = arith.constant 0 : i32
      %8 = arith.cmpi ne, %7, %c0_i32_3 : i32
      scf.if %8 {
        %cst = arith.constant 0.000000e+00 : f32
        %16 = vector.broadcast %cst : f32 to vector<16x128xf32>
        %c0_11 = arith.constant 0 : index
        %c0_12 = arith.constant 0 : index
        %17 = vector.load %arg5[%c0_11, %c0_12] : memref<16x128xf32, #tpu.memory_space<vmem>>, vector<16x128xf32>
        tpu.vector_store %arg5[%c0_11, %c0_12], %16 {strides = array<i32>} : memref<16x128xf32, #tpu.memory_space<vmem>>, vector<16x128xf32>,
      } else {
      }
      %c0 = arith.constant 0 : index
      %c0_4 = arith.constant 0 : index
      %9 = vector.load %arg5[%c0, %c0_4] : memref<16x128xf32, #tpu.memory_space<vmem>>, vector<16x128xf32>
      %c0_5 = arith.constant 0 : index
      %c0_6 = arith.constant 0 : index
      %10 = vector.load %arg3[%c0_5, %c0_6] : memref<16x128xf32, #tpu.memory_space<vmem>>, vector<16x128xf32>
      %11 = arith.addf %9, %10 : vector<16x128xf32>
      %c0_7 = arith.constant 0 : index
      %c0_8 = arith.constant 0 : index
      %12 = vector.load %arg5[%c0_7, %c0_8] : memref<16x128xf32, #tpu.memory_space<vmem>>, vector<16x128xf32>
      tpu.vector_store %arg5[%c0_7, %c0_8], %11 {strides = array<i32>} : memref<16x128xf32, #tpu.memory_space<vmem>>, vector<16x128xf32>,
      %c0_i32_9 = arith.constant 0 : i32
      %13 = arith.cmpi eq, %arg1, %c0_i32_9 : i32
      %14 = arith.extui %13 : i1 to i32
      %c0_i32_10 = arith.constant 0 : i32
      %15 = arith.cmpi ne, %14, %c0_i32_10 : i32
      scf.if %15 {
        %c0_11 = arith.constant 0 : index
        %16 = memref.load %arg2[%c0_11] : memref<2xf32, #tpu.memory_space<smem>>
        %c1 = arith.constant 1 : index
        %17 = memref.load %arg2[%c1] : memref<2xf32, #tpu.memory_space<smem>>
        %c0_12 = arith.constant 0 : index
        %c0_13 = arith.constant 0 : index
        %18 = vector.load %arg5[%c0_12, %c0_13] : memref<16x128xf32, #tpu.memory_space<vmem>>, vector<16x128xf32>
        %19 = vector.shape_cast %18 : vector<16x128xf32> to vector<1x16x128xf32>
        %cst = arith.constant dense<0.000000e+00> : vector<1xf32>
        %20 = vector.multi_reduction <add>, %19, %cst [1, 2] : vector<1x16x128xf32> to vector<1xf32>
        %21 = vector.shape_cast %20 : vector<1xf32> to vector<1x1x1xf32>
        %22 = vector.extract %21[0, 0, 0] : f32 from vector<1x1x1xf32>
        %23 = vector.broadcast %22 : f32 to vector<1x1xf32>
        %24 = vector.broadcast %17 : f32 to vector<1x1xf32>
        %25 = arith.mulf %23, %24 : vector<1x1xf32>
        %cst_14 = arith.constant 1.000000e+00 : f32
        %26 = arith.subf %cst_14, %16 : f32
        %27 = vector.broadcast %26 : f32 to vector<1x1xf32>
        %28 = arith.mulf %25, %27 : vector<1x1xf32>
        %c0_15 = arith.constant 0 : index
        %c0_16 = arith.constant 0 : index
        %29 = vector.load %arg6[%c0_15, %c0_16] : memref<1x1xf32, #tpu.memory_space<vmem>>, vector<1x1xf32>
        tpu.vector_store %arg6[%c0_15, %c0_16], %28 {strides = array<i32>} : memref<1x1xf32, #tpu.memory_space<vmem>>, vector<1x1xf32>,
      } else {
      }
    } else {
    }
    %c1_i32 = arith.constant 1 : i32
    %3 = arith.cmpi eq, %arg0, %c1_i32 : i32
    %4 = arith.extui %3 : i1 to i32
    %c0_i32_1 = arith.constant 0 : i32
    %5 = arith.cmpi ne, %4, %c0_i32_1 : i32
    scf.if %5 {
      %c0 = arith.constant 0 : index
      %6 = memref.load %arg2[%c0] : memref<2xf32, #tpu.memory_space<smem>>
      %c0_2 = arith.constant 0 : index
      %c0_3 = arith.constant 0 : index
      %7 = vector.load %arg3[%c0_2, %c0_3] : memref<16x128xf32, #tpu.memory_space<vmem>>, vector<16x128xf32>
      %8 = vector.broadcast %6 : f32 to vector<16x128xf32>
      %9 = arith.mulf %7, %8 : vector<16x128xf32>
      %c0_4 = arith.constant 0 : index
      %c0_5 = arith.constant 0 : index
      %10 = vector.load %arg6[%c0_4, %c0_5] : memref<1x1xf32, #tpu.memory_space<vmem>>, vector<1x1xf32>
      %11 = vector.broadcast %10 : vector<1x1xf32> to vector<16x128xf32>
      %12 = arith.addf %9, %11 : vector<16x128xf32>
      %c0_6 = arith.constant 0 : index
      %c0_7 = arith.constant 0 : index
      %13 = vector.load %arg4[%c0_6, %c0_7] : memref<16x128xf32, #tpu.memory_space<vmem>>, vector<16x128xf32>
      tpu.vector_store %arg4[%c0_6, %c0_7], %12 {strides = array<i32>} : memref<16x128xf32, #tpu.memory_space<vmem>>, vector<16x128xf32>,
    } else {
    }
    return
  }
  func.func @transform_0(%arg0: i32, %arg1: i32, %arg2: memref<2xf32, #tpu.memory_space<smem>>) -> (i32, i32) {
    %c0_i32 = arith.constant 0 : i32
    %c0_i32_0 = arith.constant 0 : i32
    return %arg1, %c0_i32 : i32, i32
  }
  func.func @transform_1(%arg0: i32, %arg1: i32, %arg2: memref<2xf32, #tpu.memory_space<smem>>) -> (i32, i32) {
    %0 = arith.muli %arg1, %arg0 : i32
    %c0_i32 = arith.constant 0 : i32
    %c0_i32_0 = arith.constant 0 : i32
    return %0, %c0_i32 : i32, i32
  }
}

</mosaic_0001>

<bundles_post_ra>
// kernel: tpu_custom_call.1
= control target key start
LH: loop header
LB: loop body
LE: loop exit
PB: predicated region body
PF: predicated region fallthrough
CT: control target
= control target key end

     0   :  { %s456_s9 = smov [#allocation5]   ;;  %s554_s0 = inlined_call_operand.hbm [shape: f32[2], index: 0, kind: input, shape index: {}]   ;;  %s555_s1 = inlined_call_operand.hbm [shape: f32[16,128], index: 1, kind: input, shape index: {}]   ;;  %s556_s2 = inlined_call_operand.hbm [shape: f32[16,128], index: 2, kind: output, shape index: {}]  }
   0x1   :  { %8 = dma.hbm_to_smem %s554_s0, 16, %s456_s9, [#allocation4] }
   0x2   :  { %434 = dma.done.wait [#allocation4], 16 }
   0x3   :  { %435 = vsyncadd [#allocation4], 4294967280 }
   0x4   :  { %10 = sfence }
   0x5   :  { %11 = vsyncpa [#allocation7], 0 }
   0x6   :  { %12 = vsyncpa [#allocation8], 0 }
   0x7   :  { %14 = vsyncpa [#allocation8 + $0x1], 0  ;;  %s482_s12 = smov 0   ;;  %s484_s13 = smov 0  }
   0x8   :  { %s486_s14 = smov 0  }
   0x9 LB: > { %s294_s0 = sadd.s32 4294967295, %s454_s14   ;;  %s295_s15 = sadd.s32 4294967294, %s454_s14   ;;  %s454_s14 = sphi %s486_s14, %s20_s14   ;;  %s450_s13 = sphi %s484_s13, %s561_s13   ;;  %s446_s12 = sphi %s482_s12, %s560_s12  }
   0xa   : > { %s32_s16 = sadd.s32 1, %s450_s13  ;;  %p296_p0 = scmp.ge.s32.totalorder %s454_s14, 1 }
   0xb   : > { %p34_p1 = scmp.ge.s32.totalorder %s32_s16, 2  ;;  %p91_p2 = scmp.lt.s32.totalorder %s454_s14, 3 }
   0xc   : > { %p504_p3 = scmp.eq.s32.totalorder %s294_s0, 0  ;;  %s457_s19 = smov [#allocation6]  }
   0xd   : > { %s563_s16 = smov (%p34_p1, %s32_s16), 0  ;;  %p510_p4 = pnand %p296_p0, %p91_p2 }
   0xe   : > { %s106_s20 = sshll.u32 %s457_s19, 4  ;;  %s107_s20 = int_to_ptr.vmem [resolvable:$true] %s106_s20 }
   0xf   : > { %p318_p5 = pneg %p510_p4  ;;  %s383_s21 = scalar_lea.vmem %s107_s20, 256 }
  0x10   : > { %p384_p8 = scmp.ne.s32.totalorder %s107_s20, %s383_s21  ;;  %p391_p11 = scmp.lt.s32.totalorder %s107_s20, %s107_s20 }
  0x11   : > { %p319_p6 = pnand %p504_p3, %p318_p5  ;;  %p392_p12 = scmp.lt.s32.totalorder %s383_s21, %s383_s21 }
  0x13   : > { %p374_p7 = pneg %p319_p6  ;;  %p393_p13 = por %p392_p12, %p391_p11 }
  0x15   : > { %p386_p9 = pnand %p384_p8, %p374_p7 }
  0x17   : > { %p387_p10 = pneg %p386_p9 }
  0x19   : > { %p394_p0 = pnand %p393_p13, %p387_p10 }
  0x1b   : > { %397 = shalt.err (!%p394_p0)
}
  0x1c   : > { %s458_s22 = smov 128   ;;  %s459_s23 = smov 8  }
  0x1d   : > { %321 = dma.hbm_to_vmem [thread:$0]  (!%p319_p6), %s555_s1, 256, %s107_s20, [#allocation7], %s458_s22, %s458_s22, %s459_s23  }
  0x1e   : > { %122 = sbr.rel (%p510_p4) target bundleno = 402 (0x192), region = 24 }
  0x23   : > { %437 = dma.done.wait (%p504_p3), [#allocation7], 256  }
  0x24   : > { %439 = vsyncadd (%p504_p3), [#allocation7], 4294967040  ;;  %p300_p1 = scmp.ne.s32.totalorder %s446_s12, 0 }
  0x25   : > { %s161_s26 = sld [smem:[#allocation5]] (!%p300_p1) }
  0x26   : > { %143 = sbr.rel (%p300_p1) target bundleno = 252 (0xfc), region = 32  ;;  %s301_s27 = sld [smem:[#allocation5 + $0x1]] (!%p300_p1) }
  0x2b   : > { %v152_v0 = vld [vmem:[#allocation6] sm:$0xff]  ;;  %v153_v1 = vld [vmem:[#allocation6 + $0x8] sm:$0xff]  ;;  %s178_s28 = ssub.f32 1.0, %s161_s26  ;;  %vm181_vm0 = vcmask 0  }
  0x2c   : > { %v165_v2 = vadd.f32 %v153_v1, %v152_v0  ;;  %v176_v10 = vstv %s301_s27 }
  0x2d   : > { %v179_v12 = vstv %s178_s28 }
  0x2e   : > { %166 = vadd.xlane.f32.xlu0 %v165_v2 }
  0xb7   : > { %v167_v3 = vpop.xlane.xlu0 %166 }
  0xb8   : > { %v168_v4 = vrot.slane %v167_v3, 4 }
  0xba   : > { %v169_v5 = vadd.f32 %v168_v4, %v167_v3 }
  0xbc   : > { %v170_v6 = vrot.slane %v169_v5, 2 }
  0xbe   : > { %v171_v7 = vadd.f32 %v170_v6, %v169_v5 }
  0xc0   : > { %v172_v8 = vrot.slane %v171_v7, 1 }
  0xc2   : > { %v173_v9 = vadd.f32 %v172_v8, %v171_v7 }
  0xc4   : > { %308 = vpush %v173_v9 }
  0xf5   : > { %s309_s29 = spop %308 }
  0xf6   : > { %v175_v11 = vstv %s309_s29 }
  0xf7   : > { %v177_v13 = vmul.f32 %v176_v10, %v175_v11 }
  0xf9   : > { %v180_v14 = vmul.f32 %v179_v12, %v177_v13 }
  0xfb   : > { %182 = vst.msk [vmem:[#allocation3] sm:$0x1] %vm181_vm0, %v180_v14 }
  0xfc PF: > { %p302_p2 = scmp.ne.s32.totalorder %s446_s12, 1 }
  0xfd   : > { %s187_s30 = sld [smem:[#allocation5]] (!%p302_p2) }
  0xfe   : > { %186 = sbr.rel (%p302_p2) target bundleno = 388 (0x184), region = 44 }
 0x103   : > { %v303_v15 = vld [vmem:[#allocation3] ss:$0 sm:$0xff]  ;;  %v460_v16 = vmov 0   ;;  %v188_v17 = vld [vmem:[#allocation6] sm:$0xff]  ;;  %v189_v18 = vld [vmem:[#allocation6 + $0x8] sm:$0xff]  ;;  %v190_v19 = vstv %s187_s30 }
 0x104   : > { %363 = vset.pattern.permute.xlu0 %v460_v16  ;;  %v191_v20 = vmul.f32 %v190_v19, %v188_v17  ;;  %v192_v21 = vmul.f32 %v190_v19, %v189_v18 }
 0x105   : > { %200 = vperm.xlu0 %363, %v303_v15  }
 0x180   : > { %v201_v22 = vpop.permute.xlu0 %200 }
 0x181   : > { %v203_v23 = vadd.f32 %v201_v22, %v191_v20  ;;  %v204_v24 = vadd.f32 %v201_v22, %v192_v21 }
 0x183   : > { %205 = vst [vmem:[#allocation9] sm:$0xff] %v203_v23  ;;  %206 = vst [vmem:[#allocation9 + $0x8] sm:$0xff] %v204_v24 }
 0x184 PF: > { %p531_p3 = scmp.eq.s32.totalorder %s294_s0, 1  ;;  %s461_s4 = smov [#allocation9]  }
 0x185   : > { %s222_s5 = sshll.u32 %s461_s4, 4  ;;  %s223_s5 = int_to_ptr.vmem [resolvable:$true] %s222_s5 }
 0x186   : > { %s398_s6 = scalar_lea.vmem %s223_s5, 256  ;;  %s404_s7 = scalar_lea.vmem %s223_s5, 512 }
 0x187   : > { %p399_p4 = scmp.ne.s32.totalorder %s223_s5, %s398_s6  ;;  %p405_p7 = scmp.lt.s32.totalorder %s223_s5, %s223_s5 }
 0x188   : > { %p406_p8 = scmp.lt.s32.totalorder %s404_s7, %s398_s6 }
 0x189   : > { %p400_p5 = pnand %p399_p4, %p531_p3 }
 0x18a   : > { %p407_p9 = por %p406_p8, %p405_p7 }
 0x18b   : > { %p401_p6 = pneg %p400_p5 }
 0x18d   : > { %p408_p10 = pnand %p407_p9, %p401_p6 }
 0x18f   : > { %411 = shalt.err (!%p408_p10)
}
 0x190   : > { %s462_s8 = smov 128   ;;  %s463_s9 = smov 8  }
 0x191   : > { %315 = dma.vmem_to_hbm [thread:$0]  (%p531_p3), %s223_s5, 256, %s556_s2, [#allocation8], %s462_s8, %s462_s8, %s463_s9  }
 0x192 PF: > { %p329_p11 = scmp.ge.s32.totalorder %s454_s14, 2  ;;  %p330_p12 = scmp.eq.s32.totalorder %s295_s15, 1 }
 0x194   : > { %p323_p13 = pnand %p330_p12, %p329_p11 }
 0x196   : > { %p324_p0 = pneg %p323_p13 }
 0x198   : > { %441 = dma.done.wait (%p324_p0), [#allocation8], 256  }
 0x199   : > { %443 = vsyncadd (%p324_p0), [#allocation8], 4294967040  ;;  %s20_s14 = sadd.s32 1, %s454_s14   ;;  %s560_s12 = smov %s450_s13 }
 0x19a   : > { %p17_p1 = scmp.ge.s32.totalorder %s20_s14, 4   ;;  %s561_s13 = smov %s563_s16 }
 0x19c   :  { %19 = sbr.rel (!%p17_p1) target bundleno = 9 (0x9), region = 78 }
 0x1a1   :  { %243 = vsyncpa [#allocation7], 1 }
 0x1a2   :  { %245 = vsyncpa [#allocation7 + $0x1], 1 }
 0x1a3   :  { %246 = vsyncpa [#allocation8], 1 }
 0x1a4   :  { %248 = vsyncpa [#allocation8 + $0x1], 1 }

</bundles_post_ra>
